<compile_context>
chip_gen: v7x
topology: tpu7x:2x2x1
jax: 0.10.0
libtpu: 0.0.40
codegen_flags: <defaults>
</compile_context>

<pallas_src>
import jax
import jax.numpy as jnp
import numpy as np
from jax import lax
from jax.experimental import pallas as pl
from jax.experimental.pallas import tpu as pltpu


def deform_conv2d_pallas(x, p_w, p_b, conv_w, *, ks=3, pad=1, stride=1, block_hw=None):
    assert stride == 1 and pad == 1 and ks == 3, "kernel implements the module defaults"
    B, C, H, W = x.shape
    N = ks * ks
    outc = conv_w.shape[0]
    Hp, Wp = H + 2 * pad, W + 2 * pad
    # pad the flattened width to a multiple of 8 so the (Hp, Wq, THW)->(Hp*Wq, THW) reshape
    # of the gather matrix is layout-preserving (f32 sublane tile = 8).
    Wq = ((Wp + 7) // 8) * 8
    HpWq = Hp * Wq
    HW = H * W
    f32, bf16 = jnp.float32, jnp.bfloat16

    # exact-integer f32 equality tests require every index to be exactly representable
    assert HpWq < (1 << 22) and HW < (1 << 22), "feature map too large for f32 index math"

    # ---------------- wrapper glue (XLA): offset conv, weight folding, layout ----------------
    # p_conv: ordinary 3x3 conv, pad 1, stride 1 -> (B, 2N, H, W)
    offset = lax.conv_general_dilated(
        x.astype(f32), p_w.astype(f32), window_strides=(stride, stride),
        padding=((pad, pad), (pad, pad)),
        dimension_numbers=('NCHW', 'OIHW', 'NCHW')) + p_b.astype(f32)[None, :, None, None]
    offset = offset.reshape(B, 2 * N, HW)

    # HW tiling: THW is a multiple of 128 (lane-dense output stores).
    if block_hw is None:
        # keep per-tap gmat temporaries + resident A comfortably inside scoped VMEM
        block_hw = 512 if (HpWq * 512 * 6 + 2 * N * outc * HpWq * 2) < (24 << 20) else 256
    assert block_hw % 128 == 0
    lane_hw = ((HW + 127) // 128) * 128
    THW = min(block_hw, lane_hw)
    n_hw = pl.cdiv(HW, THW)
    HW_pad = n_hw * THW
    if HW_pad != HW:
        offset = jnp.pad(offset, ((0, 0), (0, 0), (0, HW_pad - HW)))
    offset = offset.reshape(B, 2 * N, 1, HW_pad).astype(f32)

    # Fold the final ks*ks conv weights into the zero-padded input, per tap:
    #   A[b, n, oc, q] = sum_c conv_w[oc, c, n // ks, n % ks] * xpad[b, c, q]
    xpadq = jnp.pad(x.astype(f32), ((0, 0), (0, 0), (pad, pad), (pad, Wq - Wp + pad)))
    xflat = xpadq.reshape(B, C, HpWq)
    w_noc = jnp.transpose(conv_w.astype(f32).reshape(outc, C, N), (2, 0, 1))   # (N, outc, C)
    A = jnp.einsum('noc,bcq->bnoq', w_noc, xflat).astype(bf16)                 # (B, N, outc, HpWq)

    # ------------------------------------- kernel -------------------------------------
    def kernel(off_ref, a_ref, out_ref):
        # base sampling positions p_0 (padded-frame coords) for this HW tile, from iota
        hw_i = lax.broadcasted_iota(jnp.int32, (1, THW), 1) + pl.program_id(1) * THW
        hwpos = hw_i.astype(f32)
        row0 = jnp.floor((hwpos + 0.5) / W)            # exact integer row index (robust floor-div)
        base_r = row0 + 1.0                            # p_0 row in padded frame
        base_s = (hwpos - row0 * W) + 1.0              # p_0 col in padded frame

        # row / column iota of the padded frame (one-hot targets), exact f32 integers
        r_iota = lax.broadcasted_iota(jnp.int32, (Hp, 1), 0).astype(f32)       # (Hp, 1)
        s_iota = lax.broadcasted_iota(jnp.int32, (Wq, 1), 0).astype(f32)       # (Wq, 1)

        out_ref[...] = jnp.zeros_like(out_ref)

        # bounded in-kernel loop over the ks*ks taps: only one tap's gmat live at a time
        @pl.loop(0, ks)
        def _(ky):
            @pl.loop(0, ks)
            def _(kx):
                n = ky * ks + kx
                dr = ky.astype(f32) - float((ks - 1) // 2)
                dc = kx.astype(f32) - float((ks - 1) // 2)
                p_r = base_r + dr + off_ref[n]                 # (1, THW)  row positions
                p_s = base_s + dc + off_ref[N + n]             # (1, THW)  col positions

                qrf = jnp.floor(p_r)
                qsf = jnp.floor(p_s)
                qrc = jnp.clip(qrf + 1.0, 0.0, Hp - 1.0)
                qsc = jnp.clip(qsf + 1.0, 0.0, Wp - 1.0)
                qrf = jnp.clip(qrf, 0.0, Hp - 1.0)
                qsf = jnp.clip(qsf, 0.0, Wp - 1.0)
                pr = jnp.clip(p_r, 0.0, Hp - 1.0)
                ps = jnp.clip(p_s, 0.0, Wp - 1.0)
                g_rf = 1.0 + (qrf - pr)
                g_rc = 1.0 - (qrc - pr)
                g_sf = 1.0 + (qsf - ps)
                g_sc = 1.0 - (qsc - ps)

                # separable one-hot interpolation matrices (small: (Hp,THW), (Wq,THW));
                # border doubling when floor/floor+1 clip to the same cell matches the reference
                row_oh = (jnp.where(r_iota == qrf, g_rf, 0.0)
                          + jnp.where(r_iota == qrc, g_rc, 0.0))               # (Hp, THW)
                col_oh = (jnp.where(s_iota == qsf, g_sf, 0.0)
                          + jnp.where(s_iota == qsc, g_sc, 0.0))               # (Wq, THW)

                # combined gather matrix via one broadcast multiply + one cast per element
                gmat = row_oh.reshape(Hp, 1, THW) * col_oh.reshape(1, Wq, THW)
                gmat = gmat.reshape(HpWq, THW).astype(bf16)                    # (HpWq, THW)

                # weight-folded sampling + output accumulation: (outc, HpWq) @ (HpWq, THW)
                out_ref[...] += jnp.dot(a_ref[n], gmat, preferred_element_type=f32)

    # adaptive scoped-VMEM budget (double-buffered inputs/outputs + per-tap temporaries)
    a_block_bytes = N * outc * HpWq * 2
    off_block_bytes = 2 * N * THW * 4
    out_block_bytes = outc * THW * 4
    tap_tmp_bytes = HpWq * THW * 6 + (Hp + Wq) * THW * 16
    est_vmem = 2 * (a_block_bytes + off_block_bytes + out_block_bytes) + tap_tmp_bytes
    compiler_kwargs = dict(dimension_semantics=("parallel", "parallel"))
    if est_vmem > (28 << 20):
        compiler_kwargs["vmem_limit_bytes"] = int(min(est_vmem + (8 << 20), 100 << 20))

    out = pl.pallas_call(
        kernel,
        out_shape=jax.ShapeDtypeStruct((B, outc, HW_pad), f32),
        grid=(B, n_hw),
        in_specs=[
            pl.BlockSpec((None, 2 * N, 1, THW), lambda b, t: (b, 0, 0, t)),   # offsets (HW-tiled)
            pl.BlockSpec((None, N, outc, HpWq), lambda b, t: (b, 0, 0, 0)),   # weight-folded input
        ],
        out_specs=pl.BlockSpec((None, outc, THW), lambda b, t: (b, 0, t)),
        compiler_params=pltpu.CompilerParams(**compiler_kwargs),
    )(offset, A)

    return out[:, :, :HW].reshape(B, outc, H, W)


# --------------------- pure-JAX reference (mirrors the PyTorch code) ---------------------
def deform_conv2d_ref(x, p_w, p_b, conv_w, *, ks=3, pad=1, stride=1):
    B, C, H, W = x.shape
    N = ks * ks
    outc = conv_w.shape[0]
    offset = lax.conv_general_dilated(
        x, p_w, window_strides=(stride, stride), padding=((1, 1), (1, 1)),
        dimension_numbers=('NCHW', 'OIHW', 'NCHW')) + p_b[None, :, None, None]
    xpad = jnp.pad(x, ((0, 0), (0, 0), (pad, pad), (pad, pad)))
    Hp, Wp = xpad.shape[2], xpad.shape[3]
    h, w = offset.shape[2], offset.shape[3]
    pn_r = (jnp.arange(N) // ks - (ks - 1) // 2).astype(x.dtype)
    pn_s = (jnp.arange(N) % ks - (ks - 1) // 2).astype(x.dtype)
    p0_r = jnp.arange(1, h * stride + 1, stride).astype(x.dtype)
    p0_s = jnp.arange(1, w * stride + 1, stride).astype(x.dtype)
    p_r = p0_r[None, None, :, None] + pn_r[None, :, None, None] + offset[:, :N]
    p_s = p0_s[None, None, None, :] + pn_s[None, :, None, None] + offset[:, N:]
    qrf = jnp.floor(p_r); qrc = qrf + 1
    qsf = jnp.floor(p_s); qsc = qsf + 1
    qrf = jnp.clip(qrf, 0, Hp - 1); qrc = jnp.clip(qrc, 0, Hp - 1)
    qsf = jnp.clip(qsf, 0, Wp - 1); qsc = jnp.clip(qsc, 0, Wp - 1)
    pr = jnp.clip(p_r, 0, Hp - 1); ps = jnp.clip(p_s, 0, Wp - 1)
    g_lt = (1 + (qrf - pr)) * (1 + (qsf - ps))
    g_rb = (1 - (qrc - pr)) * (1 - (qsc - ps))
    g_lb = (1 + (qrf - pr)) * (1 - (qsc - ps))
    g_rt = (1 - (qrc - pr)) * (1 + (qsf - ps))
    xflat = xpad.reshape(B, C, Hp * Wp)

    def gather(qr, qs):
        idx = (qr.astype(jnp.int32) * Wp + qs.astype(jnp.int32)).reshape(B, 1, -1)
        idx = jnp.broadcast_to(idx, (B, C, idx.shape[-1]))
        return jnp.take_along_axis(xflat, idx, axis=-1).reshape(B, C, N, h, w)

    x_lt = gather(qrf, qsf); x_rb = gather(qrc, qsc)
    x_lb = gather(qrf, qsc); x_rt = gather(qrc, qsf)
    xo = (g_lt[:, None] * x_lt + g_rb[:, None] * x_rb
          + g_lb[:, None] * x_lb + g_rt[:, None] * x_rt)               # (B, C, N, h, w)
    out = jnp.einsum('ok,bkhw->bohw',
                     conv_w.reshape(outc, C * N), xo.reshape(B, C * N, h, w))
    return out


if __name__ == "__main__":
    B, C, H, W = 2, 4, 16, 16
    outc, ks = 8, 3
    N = ks * ks

    key = jax.random.PRNGKey(0)
    kx, kw, kb, kc = jax.random.split(key, 4)
    x = jax.random.normal(kx, (B, C, H, W), jnp.float32)
    # Module __init__ sets p_conv.weight = 0; use small deterministic values instead so
    # the deformable-sampling path is exercised with data-dependent fractional offsets.
    p_w = 0.1 * jax.random.normal(kw, (2 * N, C, 3, 3), jnp.float32)   # p_conv weight
    p_b = 0.1 * jax.random.normal(kb, (2 * N,), jnp.float32)           # p_conv bias
    conv_w = jax.random.normal(kc, (outc, C, ks, ks), jnp.float32) / (C * ks * ks) ** 0.5

    # block_hw=128 exercises the multi-tile HW grid (grid = (B, 2) at these shapes).
    out = jax.block_until_ready(deform_conv2d_pallas(x, p_w, p_b, conv_w, block_hw=128))
    ref = jax.block_until_ready(deform_conv2d_ref(x, p_w, p_b, conv_w))
    assert out.shape == (B, outc, H, W)
    if not np.allclose(np.asarray(out), np.asarray(ref), atol=5e-2, rtol=5e-2):
        raise AssertionError("Pallas kernel does not match reference")
    print("KERNEL_OK")
</pallas_src>

<mosaic_0001>
module attributes {stable_mosaic.version = 11 : i64} {
  func.func @kernel(%arg0: i32, %arg1: i32, %arg2: memref<1x18x1x128xf32, #tpu.memory_space<vmem>>, %arg3: memref<1x9x8x432xbf16, #tpu.memory_space<vmem>>, %arg4: memref<1x8x128xf32, #tpu.memory_space<vmem>>) attributes {dimension_semantics = [#tpu.dimension_semantics<parallel>, #tpu.dimension_semantics<parallel>], iteration_bounds = array<i64: 2, 2>, scalar_prefetch = 0 : i64, scratch_operands = 0 : i64, tpu.core_type = #tpu.core_type<tc>, window_params = [{transform_indices = @transform_0, window_bounds = array<i64: 1, 18, 1, 128>}, {transform_indices = @transform_1, window_bounds = array<i64: 1, 9, 8, 432>}, {transform_indices = @transform_2, window_bounds = array<i64: 1, 8, 128>}]} {
    %0 = tpu.iota {dimensions = array<i32: 1>} : vector<1x128xi32>
    %c128_i32 = arith.constant 128 : i32
    %1 = arith.muli %arg1, %c128_i32 : i32
    %2 = vector.broadcast %1 : i32 to vector<1x128xi32>
    %3 = arith.addi %0, %2 : vector<1x128xi32>
    %4 = arith.sitofp %3 : vector<1x128xi32> to vector<1x128xf32>
    %cst = arith.constant 5.000000e-01 : f32
    %5 = vector.broadcast %cst : f32 to vector<1x128xf32>
    %6 = arith.addf %4, %5 : vector<1x128xf32>
    %cst_0 = arith.constant 1.600000e+01 : f32
    %7 = vector.broadcast %cst_0 : f32 to vector<1x128xf32>
    %8 = arith.divf %6, %7 : vector<1x128xf32>
    %9 = math.floor %8 : vector<1x128xf32>
    %cst_1 = arith.constant 1.000000e+00 : f32
    %10 = vector.broadcast %cst_1 : f32 to vector<1x128xf32>
    %11 = arith.addf %9, %10 : vector<1x128xf32>
    %cst_2 = arith.constant 1.600000e+01 : f32
    %12 = vector.broadcast %cst_2 : f32 to vector<1x128xf32>
    %13 = arith.mulf %9, %12 : vector<1x128xf32>
    %14 = arith.subf %4, %13 : vector<1x128xf32>
    %cst_3 = arith.constant 1.000000e+00 : f32
    %15 = vector.broadcast %cst_3 : f32 to vector<1x128xf32>
    %16 = arith.addf %14, %15 : vector<1x128xf32>
    %17 = tpu.iota {dimensions = array<i32: 0>} : vector<18x1xi32>
    %18 = arith.sitofp %17 : vector<18x1xi32> to vector<18x1xf32>
    %19 = tpu.iota {dimensions = array<i32: 0>} : vector<24x1xi32>
    %20 = arith.sitofp %19 : vector<24x1xi32> to vector<24x1xf32>
    %cst_4 = arith.constant 0.000000e+00 : f32
    %21 = vector.broadcast %cst_4 : f32 to vector<8x128xf32>
    %c0 = arith.constant 0 : index
    %c0_5 = arith.constant 0 : index
    %c0_6 = arith.constant 0 : index
    %22 = vector.load %arg4[%c0, %c0_5, %c0_6] : memref<1x8x128xf32, #tpu.memory_space<vmem>>, vector<1x8x128xf32>
    %23 = vector.shape_cast %22 : vector<1x8x128xf32> to vector<8x128xf32>
    %24 = vector.shape_cast %21 : vector<8x128xf32> to vector<1x8x128xf32>
    tpu.vector_store %arg4[%c0, %c0_5, %c0_6], %24 {strides = array<i32>} : memref<1x8x128xf32, #tpu.memory_space<vmem>>, vector<1x8x128xf32>,
    %c0_i32 = arith.constant 0 : i32
    %c3_i32 = arith.constant 3 : i32
    %25 = arith.addi %c0_i32, %c3_i32 : i32
    %c1_i32 = arith.constant 1 : i32
    scf.for %arg5 = %c0_i32 to %25 step %c1_i32  : i32 {
      %c1_i32_8 = arith.constant 1 : i32
      %26 = arith.muli %arg5, %c1_i32_8 : i32
      %c0_i32_9 = arith.constant 0 : i32
      %27 = arith.addi %c0_i32_9, %26 : i32
      %c0_i32_10 = arith.constant 0 : i32
      %c3_i32_11 = arith.constant 3 : i32
      %28 = arith.addi %c0_i32_10, %c3_i32_11 : i32
      %c1_i32_12 = arith.constant 1 : i32
      scf.for %arg6 = %c0_i32_10 to %28 step %c1_i32_12  : i32 {
        %c1_i32_14 = arith.constant 1 : i32
        %29 = arith.muli %arg6, %c1_i32_14 : i32
        %c0_i32_15 = arith.constant 0 : i32
        %30 = arith.addi %c0_i32_15, %29 : i32
        %c3_i32_16 = arith.constant 3 : i32
        %31 = arith.muli %27, %c3_i32_16 : i32
        %32 = arith.addi %31, %30 : i32
        %33 = arith.sitofp %27 : i32 to f32
        %cst_17 = arith.constant 1.000000e+00 : f32
        %34 = arith.subf %33, %cst_17 : f32
        %35 = arith.sitofp %30 : i32 to f32
        %cst_18 = arith.constant 1.000000e+00 : f32
        %36 = arith.subf %35, %cst_18 : f32
        %37 = vector.broadcast %34 : f32 to vector<1x128xf32>
        %38 = arith.addf %11, %37 : vector<1x128xf32>
        %c0_19 = arith.constant 0 : index
        %39 = arith.index_cast %32 : i32 to index
        %c0_20 = arith.constant 0 : index
        %c0_21 = arith.constant 0 : index
        %40 = vector.load %arg2[%c0_19, %39, %c0_20, %c0_21] : memref<1x18x1x128xf32, #tpu.memory_space<vmem>>, vector<1x1x1x128xf32>
        %41 = vector.shape_cast %40 : vector<1x1x1x128xf32> to vector<1x128xf32>
        %42 = arith.addf %38, %41 : vector<1x128xf32>
        %43 = vector.broadcast %36 : f32 to vector<1x128xf32>
        %44 = arith.addf %16, %43 : vector<1x128xf32>
        %c9_i32 = arith.constant 9 : i32
        %45 = arith.addi %c9_i32, %32 : i32
        %c0_22 = arith.constant 0 : index
        %46 = arith.index_cast %45 : i32 to index
        %c0_23 = arith.constant 0 : index
        %c0_24 = arith.constant 0 : index
        %47 = vector.load %arg2[%c0_22, %46, %c0_23, %c0_24] : memref<1x18x1x128xf32, #tpu.memory_space<vmem>>, vector<1x1x1x128xf32>
        %48 = vector.shape_cast %47 : vector<1x1x1x128xf32> to vector<1x128xf32>
        %49 = arith.addf %44, %48 : vector<1x128xf32>
        %50 = math.floor %42 : vector<1x128xf32>
        %51 = math.floor %49 : vector<1x128xf32>
        %cst_25 = arith.constant 1.000000e+00 : f32
        %52 = vector.broadcast %cst_25 : f32 to vector<1x128xf32>
        %53 = arith.addf %50, %52 : vector<1x128xf32>
        %cst_26 = arith.constant 0.000000e+00 : f32
        %cst_27 = arith.constant 1.700000e+01 : f32
        %54 = vector.broadcast %cst_26 : f32 to vector<1x128xf32>
        %55 = arith.maximumf %54, %53 : vector<1x128xf32>
        %56 = vector.broadcast %cst_27 : f32 to vector<1x128xf32>
        %57 = arith.minimumf %56, %55 : vector<1x128xf32>
        %cst_28 = arith.constant 1.000000e+00 : f32
        %58 = vector.broadcast %cst_28 : f32 to vector<1x128xf32>
        %59 = arith.addf %51, %58 : vector<1x128xf32>
        %cst_29 = arith.constant 0.000000e+00 : f32
        %cst_30 = arith.constant 1.700000e+01 : f32
        %60 = vector.broadcast %cst_29 : f32 to vector<1x128xf32>
        %61 = arith.maximumf %60, %59 : vector<1x128xf32>
        %62 = vector.broadcast %cst_30 : f32 to vector<1x128xf32>
        %63 = arith.minimumf %62, %61 : vector<1x128xf32>
        %cst_31 = arith.constant 0.000000e+00 : f32
        %cst_32 = arith.constant 1.700000e+01 : f32
        %64 = vector.broadcast %cst_31 : f32 to vector<1x128xf32>
        %65 = arith.maximumf %64, %50 : vector<1x128xf32>
        %66 = vector.broadcast %cst_32 : f32 to vector<1x128xf32>
        %67 = arith.minimumf %66, %65 : vector<1x128xf32>
        %cst_33 = arith.constant 0.000000e+00 : f32
        %cst_34 = arith.constant 1.700000e+01 : f32
        %68 = vector.broadcast %cst_33 : f32 to vector<1x128xf32>
        %69 = arith.maximumf %68, %51 : vector<1x128xf32>
        %70 = vector.broadcast %cst_34 : f32 to vector<1x128xf32>
        %71 = arith.minimumf %70, %69 : vector<1x128xf32>
        %cst_35 = arith.constant 0.000000e+00 : f32
        %cst_36 = arith.constant 1.700000e+01 : f32
        %72 = vector.broadcast %cst_35 : f32 to vector<1x128xf32>
        %73 = arith.maximumf %72, %42 : vector<1x128xf32>
        %74 = vector.broadcast %cst_36 : f32 to vector<1x128xf32>
        %75 = arith.minimumf %74, %73 : vector<1x128xf32>
        %cst_37 = arith.constant 0.000000e+00 : f32
        %cst_38 = arith.constant 1.700000e+01 : f32
        %76 = vector.broadcast %cst_37 : f32 to vector<1x128xf32>
        %77 = arith.maximumf %76, %49 : vector<1x128xf32>
        %78 = vector.broadcast %cst_38 : f32 to vector<1x128xf32>
        %79 = arith.minimumf %78, %77 : vector<1x128xf32>
        %80 = arith.subf %67, %75 : vector<1x128xf32>
        %cst_39 = arith.constant 1.000000e+00 : f32
        %81 = vector.broadcast %cst_39 : f32 to vector<1x128xf32>
        %82 = arith.addf %81, %80 : vector<1x128xf32>
        %83 = arith.subf %57, %75 : vector<1x128xf32>
        %cst_40 = arith.constant 1.000000e+00 : f32
        %84 = vector.broadcast %cst_40 : f32 to vector<1x128xf32>
        %85 = arith.subf %84, %83 : vector<1x128xf32>
        %86 = arith.subf %71, %79 : vector<1x128xf32>
        %cst_41 = arith.constant 1.000000e+00 : f32
        %87 = vector.broadcast %cst_41 : f32 to vector<1x128xf32>
        %88 = arith.addf %87, %86 : vector<1x128xf32>
        %89 = arith.subf %63, %79 : vector<1x128xf32>
        %cst_42 = arith.constant 1.000000e+00 : f32
        %90 = vector.broadcast %cst_42 : f32 to vector<1x128xf32>
        %91 = arith.subf %90, %89 : vector<1x128xf32>
        %92 = vector.broadcast %18 : vector<18x1xf32> to vector<18x128xf32>
        %93 = vector.broadcast %67 : vector<1x128xf32> to vector<18x128xf32>
        %94 = arith.cmpf oeq, %92, %93 : vector<18x128xf32>
        %cst_43 = arith.constant 0.000000e+00 : f32
        %95 = vector.shape_cast %82 : vector<1x128xf32> to vector<1x128xf32>
        %96 = vector.broadcast %95 : vector<1x128xf32> to vector<18x128xf32>
        %97 = vector.broadcast %cst_43 : f32 to vector<18x128xf32>
        %98 = arith.select %94, %96, %97 : vector<18x128xi1>, vector<18x128xf32>
        %99 = vector.broadcast %18 : vector<18x1xf32> to vector<18x128xf32>
        %100 = vector.broadcast %57 : vector<1x128xf32> to vector<18x128xf32>
        %101 = arith.cmpf oeq, %99, %100 : vector<18x128xf32>
        %cst_44 = arith.constant 0.000000e+00 : f32
        %102 = vector.shape_cast %85 : vector<1x128xf32> to vector<1x128xf32>
        %103 = vector.broadcast %102 : vector<1x128xf32> to vector<18x128xf32>
        %104 = vector.broadcast %cst_44 : f32 to vector<18x128xf32>
        %105 = arith.select %101, %103, %104 : vector<18x128xi1>, vector<18x128xf32>
        %106 = arith.addf %98, %105 : vector<18x128xf32>
        %107 = vector.broadcast %20 : vector<24x1xf32> to vector<24x128xf32>
        %108 = vector.broadcast %71 : vector<1x128xf32> to vector<24x128xf32>
        %109 = arith.cmpf oeq, %107, %108 : vector<24x128xf32>
        %cst_45 = arith.constant 0.000000e+00 : f32
        %110 = vector.shape_cast %88 : vector<1x128xf32> to vector<1x128xf32>
        %111 = vector.broadcast %110 : vector<1x128xf32> to vector<24x128xf32>
        %112 = vector.broadcast %cst_45 : f32 to vector<24x128xf32>
        %113 = arith.select %109, %111, %112 : vector<24x128xi1>, vector<24x128xf32>
        %114 = vector.broadcast %20 : vector<24x1xf32> to vector<24x128xf32>
        %115 = vector.broadcast %63 : vector<1x128xf32> to vector<24x128xf32>
        %116 = arith.cmpf oeq, %114, %115 : vector<24x128xf32>
        %cst_46 = arith.constant 0.000000e+00 : f32
        %117 = vector.shape_cast %91 : vector<1x128xf32> to vector<1x128xf32>
        %118 = vector.broadcast %117 : vector<1x128xf32> to vector<24x128xf32>
        %119 = vector.broadcast %cst_46 : f32 to vector<24x128xf32>
        %120 = arith.select %116, %118, %119 : vector<24x128xi1>, vector<24x128xf32>
        %121 = arith.addf %113, %120 : vector<24x128xf32>
        %122 = vector.shape_cast %106 : vector<18x128xf32> to vector<18x1x128xf32>
        %123 = vector.shape_cast %121 : vector<24x128xf32> to vector<1x24x128xf32>
        %124 = vector.broadcast %122 : vector<18x1x128xf32> to vector<18x24x128xf32>
        %125 = vector.broadcast %123 : vector<1x24x128xf32> to vector<18x24x128xf32>
        %126 = arith.mulf %124, %125 : vector<18x24x128xf32>
        %127 = vector.shape_cast %126 : vector<18x24x128xf32> to vector<432x128xf32>
        %128 = arith.truncf %127 : vector<432x128xf32> to vector<432x128xbf16>
        %c0_47 = arith.constant 0 : index
        %c0_48 = arith.constant 0 : index
        %c0_49 = arith.constant 0 : index
        %129 = vector.load %arg4[%c0_47, %c0_48, %c0_49] : memref<1x8x128xf32, #tpu.memory_space<vmem>>, vector<1x8x128xf32>
        %130 = vector.shape_cast %129 : vector<1x8x128xf32> to vector<8x128xf32>
        %c0_50 = arith.constant 0 : index
        %131 = arith.index_cast %32 : i32 to index
        %c0_51 = arith.constant 0 : index
        %c0_52 = arith.constant 0 : index
        %132 = vector.load %arg3[%c0_50, %131, %c0_51, %c0_52] : memref<1x9x8x432xbf16, #tpu.memory_space<vmem>>, vector<1x1x8x432xbf16>
        %133 = vector.shape_cast %132 : vector<1x1x8x432xbf16> to vector<8x432xbf16>
        %cst_53 = arith.constant dense<0.000000e+00> : vector<8x128xf32>
        %134 = tpu.matmul %133, %128, %cst_53 {dimension_numbers = #tpu.dot_dimension_numbers<[1], [0], [0], [1], [0, 0, 1, 1], [], []>} : vector<8x432xbf16>, vector<432x128xbf16>, vector<8x128xf32> -> vector<8x128xf32>
        %135 = arith.addf %130, %134 : vector<8x128xf32>
        %c0_54 = arith.constant 0 : index
        %c0_55 = arith.constant 0 : index
        %c0_56 = arith.constant 0 : index
        %136 = vector.load %arg4[%c0_54, %c0_55, %c0_56] : memref<1x8x128xf32, #tpu.memory_space<vmem>>, vector<1x8x128xf32>
        %137 = vector.shape_cast %136 : vector<1x8x128xf32> to vector<8x128xf32>
        %138 = vector.shape_cast %135 : vector<8x128xf32> to vector<1x8x128xf32>
        tpu.vector_store %arg4[%c0_54, %c0_55, %c0_56], %138 {strides = array<i32>} : memref<1x8x128xf32, #tpu.memory_space<vmem>>, vector<1x8x128xf32>,
      }
      %c3_i32_13 = arith.constant 3 : i32
    }
    %c3_i32_7 = arith.constant 3 : i32
    return
  }
  func.func @transform_0(%arg0: i32, %arg1: i32) -> (i32, i32, i32, i32) {
    %c0_i32 = arith.constant 0 : i32
    %c0_i32_0 = arith.constant 0 : i32
    %c0_i32_1 = arith.constant 0 : i32
    return %arg0, %c0_i32, %c0_i32_0, %arg1 : i32, i32, i32, i32
  }
  func.func @transform_1(%arg0: i32, %arg1: i32) -> (i32, i32, i32, i32) {
    %c0_i32 = arith.constant 0 : i32
    %c0_i32_0 = arith.constant 0 : i32
    %c0_i32_1 = arith.constant 0 : i32
    %c0_i32_2 = arith.constant 0 : i32
    return %arg0, %c0_i32, %c0_i32_0, %c0_i32_1 : i32, i32, i32, i32
  }
  func.func @transform_2(%arg0: i32, %arg1: i32) -> (i32, i32, i32) {
    %c0_i32 = arith.constant 0 : i32
    %c0_i32_0 = arith.constant 0 : i32
    return %arg0, %c0_i32, %arg1 : i32, i32, i32
  }
}

</mosaic_0001>

<bundles_post_ra>
// kernel: tpu_custom_call.1
= control target key start
LH: loop header
LB: loop body
LE: loop exit
PB: predicated region body
PF: predicated region fallthrough
CT: control target
= control target key end

     0   :  { %s1870_s0 = inlined_call_operand.hbm [shape: f32[2,18,1,256], index: 0, kind: input, shape index: {}]   ;;  %s1871_s1 = inlined_call_operand.hbm [shape: bf16[2,9,8,432], index: 1, kind: input, shape index: {}]   ;;  %s1872_s2 = inlined_call_operand.hbm [shape: f32[2,8,256], index: 2, kind: output, shape index: {}]  }
   0x1   :  { %1884 = sst [smem:[#allocation14_spill]] %s1870_s0 }
   0x2   :  { %7 = vsyncpa [#allocation3], 0 }
   0x3   :  { %9 = vsyncpa [#allocation3 + $0x1], 0 }
   0x4   :  { %10 = vsyncpa [#allocation6], 0 }
   0x5   :  { %12 = vsyncpa [#allocation6 + $0x1], 0 }
   0x6   :  { %13 = vsyncpa [#allocation4], 0 }
   0x7   :  { %15 = vsyncpa [#allocation4 + $0x1], 0  ;;  %s1317_s9 = smov 0   ;;  %s1319_s10 = smov 0  }
   0x8   :  { %s1321_s11 = smov 0   ;;  %s1323_s12 = smov 0  }
   0x9   :  { %s1325_s13 = smov 0   ;;  %s1327_s14 = smov 0  }
   0xa   :  { %s1329_s15 = smov 0   ;;  %s1331_s16 = smov 0  }
   0xb   :  { %s1333_s17 = smov 0   ;;  %s1335_s18 = smov 0  }
   0xc   :  { %s1337_s19 = smov 0  }
   0xd LB: > { %1885 = sst [smem:[#allocation11_spill]] %s1278_s18  ;;  %s1873_s20 = sadd.s32 4294967295, %s1282_s19   ;;  %s1282_s19 = sphi %s1337_s19, %s21_s19   ;;  %s1278_s18 = sphi %s1335_s18, %s1910_s18   ;;  %s1274_s17 = sphi %s1333_s17, %s1918_s17   ;;  %s1270_s16 = sphi %s1331_s16, %s1908_s16   ;;  %s1266_s15 = sphi %s1329_s15, %s1917_s15   ;;  %s1262_s14 = sphi %s1327_s14, %s1916_s14   ;;  %s1258_s13 = sphi %s1325_s13, %s1915_s13   ;;  %s1254_s12 = sphi %s1323_s12, %s1914_s12   ;;  %s1250_s11 = sphi %s1321_s11, %s1913_s11   ;;  %s1246_s10 = sphi %s1319_s10, %s1912_s10   ;;  %s1242_s9 = sphi %s1317_s9, %s1911_s9  }
   0xe   : > { %s902_s21 = sadd.s32 4294967294, %s1282_s19   ;;  %s30_s22 = sadd.s32 1, %s1274_s17 }
   0xf   : > { %s33_s23 = sadd.s32 1, %s1278_s18  ;;  %p31_p0 = scmp.ge.s32.totalorder %s30_s22, 2 }
  0x10   : > { %s42_s24 = sadd.s32 1, %s1262_s14  ;;  %p49_p1 = scmp.ne.s32.totalorder %s1262_s14, %s1258_s13 }
  0x11   : > { %p1876_p2 = scmp.eq.s32.totalorder %s1282_s19, 0  ;;  %s1920_s22 = smov (%p31_p0, %s30_s22), 0 }
  0x12   : > { %1886 = sst [smem:[#allocation12_spill]] %s1920_s22  ;;  %s1922_s23 = smov (!%p31_p0, %s33_s23), %s1278_s18 }
  0x13   : > { %s38_s25 = ssub.s32 %s1274_s17, %s1920_s22  ;;  %p1387_p3 = por %p1876_p2, %p49_p1 }
  0x14   : > { %p35_p4 = scmp.ge.s32.totalorder %s1922_s23, 2  ;;  %p1877_p5 = scmp.ne.s32.totalorder %s1258_s13, %s1254_s12 }
  0x15   : > { %p107_p6 = scmp.eq.s32.totalorder %s1873_s20, 3  ;;  %p113_p7 = scmp.eq.s32.totalorder %s902_s21, 3 }
  0x16   : > { %s1924_s23 = smov (%p35_p4, %s1922_s23), 0  ;;  %p1875_p12 = scmp.lt.s32.totalorder %s1282_s19, 4 }
  0x17   : > { %1888 = sst [smem:[#allocation13_spill]] %s1924_s23  ;;  %p1397_p8 = por %p107_p6, %p49_p1 }
  0x18   : > { %p1404_p9 = por %p113_p7, %p1877_p5  ;;  %s1410_s29 = ssub.s32 %s1278_s18, %s1924_s23 }
  0x19   : > { %s1889_s27 = scalar_select %p1397_p8, 1, 0 }
  0x1a   : > { %s1890_s28 = scalar_select %p1404_p9, 1, 0 }
  0x1b   : > { %s39_s30 = sor.u32 %s38_s25, %s1410_s29  ;;  %s133_s3 = sand.u32 1, %s1262_s14  }
  0x1c   : > { %p40_p11 = scmp.eq.s32.totalorder %s39_s30, 0  ;;  %s949_s4 = smul.u32 36, %s1278_s18 }
  0x1d   : > { %s948_s6 = smul.u32 18, %s133_s3  ;;  %p1425_p13 = pnand %p1875_p12, %p1387_p3 }
  0x1e   : > { %s1418_s5 = scalar_select %p40_p11, %s1262_s14, %s42_s24  }
  0x1f   : > { %s142_s7 = sadd.s32 %s1274_s17, %s949_s4  ;;  %s1892_s0 = sld [smem:[#allocation14_spill]] }
  0x20   : > { %s905_s21 = sshll.u32 %s142_s7, 4  ;;  %s137_s24 = scalar_lea.vmem [#allocation2], %s948_s6 }
  0x21   : > { %s145_s4 = sshll.u32 %s137_s24, 4  ;;  %s1437_s26 = scalar_lea.sflag [#allocation3], %s133_s3  ;;  %s1434_s4 = int_to_ptr.vmem [resolvable:$true] %s145_s4 }
  0x22   : > { %p1090_p3 = pneg %p1425_p13 }
  0x25   : > { %s1432_s30 = scalar_lea.hbm %s1892_s0, %s905_s21  ;;  %s1093_s21 = scalar_lea.hbm %s1892_s0, 1152 }
  0x26   : > { %s1088_s23 = scalar_lea.hbm %s1432_s30, 288  ;;  %p1094_p7 = scmp.lt.u32.totalorder %s1432_s30, %s1892_s0 }
  0x27   : > { %p1089_p1 = scmp.ne.s32.totalorder %s1432_s30, %s1088_s23  ;;  %p1095_p11 = scmp.lt.u32.totalorder %s1093_s21, %s1088_s23 }
  0x28   : > { %p1097_p2 = scmp.lt.u32.totalorder %s1088_s23, %s1432_s30 }
  0x29   : > { %p1091_p4 = pnand %p1090_p3, %p1089_p1  ;;  %p1096_p12 = por %p1095_p11, %p1094_p7 }
  0x2b   : > { %p1092_p6 = pneg %p1091_p4  ;;  %p1098_p5 = por %p1097_p2, %p1096_p12 }
  0x2d   : > { %p1099_p10 = pnand %p1098_p5, %p1092_p6 }
  0x2f   : > { %1102 = shalt.err (!%p1099_p10)
}
  0x30   : > { %s1103_s3 = scalar_lea.vmem %s1434_s4, 288  ;;  %s1292_s24 = smov [#allocation2]  }
  0x31   : > { %p1104_p1 = scmp.ne.s32.totalorder %s1434_s4, %s1103_s3  ;;  %s1108_s20 = sshll.u32 %s1292_s24, 4  ;;  %s1109_s20 = int_to_ptr.vmem [resolvable:$false] %s1108_s20 }
  0x32   : > { %s1110_s7 = scalar_lea.vmem %s1109_s20, 576  ;;  %p1111_p9 = scmp.lt.s32.totalorder %s1434_s4, %s1109_s20 }
  0x33   : > { %p1106_p4 = pnand %p1104_p1, %p1090_p3  ;;  %p1112_p7 = scmp.lt.s32.totalorder %s1110_s7, %s1103_s3 }
  0x35   : > { %p1107_p0 = pneg %p1106_p4  ;;  %p1113_p11 = por %p1112_p7, %p1111_p9 }
  0x37   : > { %p1114_p2 = pnand %p1113_p11, %p1107_p0 }
  0x39   : > { %1117 = shalt.err (!%p1114_p2)
}
  0x3a   : > { %s1293_s23 = smov 32   ;;  %s1878_s21 = smov 16  }
  0x3b   : > { %s1295_s25 = smov 1   ;;  %p174_p5 = scmp.lt.s32.totalorder %s1282_s19, 5 }
  0x3c   : > { %963 = dma.hbm_to_vmem [thread:$0]  (!%p1425_p13), %s1432_s30, 288, %s1434_s4, %s1437_s26, %s1293_s23, %s1878_s21, %s1295_s25  }
  0x3d   : > { %p1893_p9 = scmp.ge.s32.totalorder %s1282_s19, 1  ;;  %s1895_s3 = sadd.s32 4294967295, %s1282_s19  }
  0x3e   : > { %p56_p12 = scmp.eq.s32.totalorder %s1895_s3, 0  ;;  %s68_s24 = sadd.s32 1, %s1250_s11 }
  0x3f   : > { %p1469_p10 = pnand %p1893_p9, %p174_p5  ;;  %p1896_p0 = scmp.eq.s32.totalorder %s1410_s29, 0 }
  0x40   : > { %p1897_p3 = scmp.ne.s32.totalorder %s1258_s13, %s1254_s12  ;;  %p75_p1 = scmp.ne.s32.totalorder %s1250_s11, %s1246_s10 }
  0x41   : > { %s1479_s20 = scalar_select %p1896_p0, %s1250_s11, %s68_s24  }
  0x42   : > { %p1484_p6 = por %p56_p12, %p1897_p3  ;;  %p81_p4 = scmp.ne.s32.totalorder %s1246_s10, %s1242_s9 }
  0x43   : > { %s155_s8 = sand.u32 1, %s1250_s11   ;;  %p1899_p13 = scmp.eq.s32.totalorder %s1282_s19, 0 }
  0x44   : > { %s1898_s7 = scalar_select %p1484_p6, 1, 0 }
  0x45   : > { %p77_p7 = por %p75_p1, %p1899_p13  ;;  %p1495_p11 = por %p81_p4, %p56_p12 }
  0x46   : > { %s950_s4 = smul.u32 144, %s155_s8  ;;  %p1901_p2 = scmp.lt.s32.totalorder %s1282_s19, 4 }
  0x47   : > { %s1900_s30 = scalar_select %p1495_p11, 1, 0 }
  0x48   : > { %s951_s26 = smul.u32 2304, %s1278_s18  ;;  %p1502_p5 = pnand %p1901_p2, %p77_p7 }
  0x49   : > { %s159_s3 = scalar_lea.vmem [#allocation5], %s950_s4  ;;  %s1513_s21 = scalar_lea.sflag [#allocation6], %s155_s8 }
  0x4a   : > { %s1509_s9 = scalar_lea.hbm %s1871_s1, %s951_s26  ;;  %s166_s24 = sshll.u32 %s159_s3, 4  ;;  %s1511_s24 = int_to_ptr.vmem [resolvable:$true] %s166_s24 }
  0x4b   : > { %s1118_s0 = scalar_lea.hbm %s1509_s9, 2304  ;;  %p1120_p12 = pneg %p1502_p5 }
  0x4c   : > { %p1119_p9 = scmp.ne.s32.totalorder %s1509_s9, %s1118_s0  ;;  %s1123_s25 = scalar_lea.hbm %s1871_s1, 4608 }
  0x4d   : > { %p1124_p1 = scmp.lt.u32.totalorder %s1509_s9, %s1871_s1  ;;  %p1125_p4 = scmp.lt.u32.totalorder %s1123_s25, %s1118_s0 }
  0x4e   : > { %p1121_p0 = pnand %p1120_p12, %p1119_p9  ;;  %p1127_p7 = scmp.lt.u32.totalorder %s1118_s0, %s1509_s9 }
  0x4f   : > { %p1126_p13 = por %p1125_p4, %p1124_p1 }
  0x50   : > { %p1122_p3 = pneg %p1121_p0 }
  0x51   : > { %p1128_p2 = por %p1127_p7, %p1126_p13 }
  0x53   : > { %p1129_p8 = pnand %p1128_p2, %p1122_p3 }
  0x55   : > { %1132 = shalt.err (!%p1129_p8)
}
  0x56   : > { %s1133_s8 = scalar_lea.vmem %s1511_s24, 2304  ;;  %s1296_s4 = smov [#allocation5]  }
  0x57   : > { %p1134_p9 = scmp.ne.s32.totalorder %s1511_s24, %s1133_s8  ;;  %s1138_s3 = sshll.u32 %s1296_s4, 4  ;;  %s1139_s3 = int_to_ptr.vmem [resolvable:$false] %s1138_s3 }
  0x58   : > { %s1140_s18 = scalar_lea.vmem %s1139_s3, 4608  ;;  %p1141_p6 = scmp.lt.s32.totalorder %s1511_s24, %s1139_s3 }
  0x59   : > { %p1136_p0 = pnand %p1134_p9, %p1120_p12  ;;  %p1142_p1 = scmp.lt.s32.totalorder %s1140_s18, %s1133_s8 }
  0x5b   : > { %p1137_p11 = pneg %p1136_p0  ;;  %p1143_p4 = por %p1142_p1, %p1141_p6 }
  0x5d   : > { %p1144_p13 = pnand %p1143_p4, %p1137_p11 }
  0x5f   : > { %1147 = shalt.err (!%p1144_p13)
}
  0x60   : > { %s1297_s0 = smov 256   ;;  %s1903_s22 = smov 16  }
  0x61   : > { %966 = dma.hbm_to_vmem [thread:$0]  (!%p1502_p5), %s1509_s9, 2304, %s1511_s24, %s1513_s21, %s1297_s0, %s1297_s0, %s1903_s22  }
  0x62   : > { %178 = sbr.rel (%p1469_p10) target bundleno = 458 (0x1ca), region = 28  ;;  %s1545_s26 = sand.u32 (!%p1469_p10), 1, %s1258_s13  }
  0x63   : > { %s952_s23 = smul.u32 (!%p1469_p10), 18, %s1545_s26  ;;  %s181_s25 = scalar_lea.sflag (!%p1469_p10), [#allocation3], %s1545_s26 }
  0x64   : > { %p1904_p8 = scmp.ne.s32.totalorder (!%p1469_p10), %s1898_s7, 0 }
  0x65   : > { %s1549_s8 = scalar_lea.vmem (!%p1469_p10), [#allocation2], %s952_s23 }
  0x69   : > { %1229 = dma.done.wait (%p1904_p8), %s181_s25, 288  }
  0x6a   : > { %1231 = vsyncadd (%p1904_p8), %s181_s25, 4294967008  ;;  %s189_s21 = sand.u32 1, %s1246_s10   ;;  %p1905_p10 = scmp.ne.s32.totalorder %s1900_s30, 0 }
  0x6b   : > { %s1556_s6 = smul.u32 144, %s189_s21  ;;  %s190_s29 = scalar_lea.sflag [#allocation6], %s189_s21 }
  0x6d   : > { %s193_s9 = scalar_lea.vmem [#allocation5], %s1556_s6 }
  0x6e   : > { %1233 = dma.done.wait (%p1905_p10), %s190_s29, 2304  }
  0x6f   : > { %1235 = vsyncadd (%p1905_p10), %s190_s29, 4294964992  ;;  %s908_s24 = sshll.u32 %s1545_s26, 3  ;;  %v220_v0 = vlaneseq  ;;  %s909_s4 = sshll.u32 %s1266_s15, 7  ;;  %v1298_v4 = vmov 0.0  }
  0x70   : > { %v223_v1 = vstv %s909_s4  ;;  %s1567_s7 = scalar_lea.vmem [#allocation7], %s908_s24  ;;  %s1583_s30 = smov 0  }
  0x71   : > { %v221_v2 = vand.u32 127, %v220_v0  ;;  %v1565_v3 = vshrl.u32 %v220_v0, 7  ;;  %241 = vst [vmem:[%s1567_s7] sm:$0xff] %v1298_v4 }
  0x73   : > { %v224_v5 = vadd.s32 %v223_v1, %v221_v2  ;;  %v236_v6 = vadd.s32 8, %v1565_v3  ;;  %v237_v7 = vadd.s32 16, %v1565_v3  ;;  %v1573_v8 = vcvt.s32.f32 %v1565_v3 }
  0x75   : > { %v225_v9 = vcvt.s32.f32 %v224_v5  ;;  %v1575_v10 = vcvt.s32.f32 %v236_v6  ;;  %v1577_v11 = vcvt.s32.f32 %v237_v7 }
  0x77   : > { %v226_v12 = vadd.f32 0.5, %v225_v9 }
  0x79   : > { %v228_v13 = vmul.f32 0.0625, %v226_v12 }
  0x7b   : > { %v229_v14 = vfloor.f32 %v228_v13 }
  0x7d   : > { %v1579_v15 = vadd.f32 1.0, %v229_v14  ;;  %v231_v16 = vmul.f32 16.0, %v229_v14 }
  0x7f   : > { %v232_v17 = vsub.f32 %v225_v9, %v231_v16 }
  0x81   : > { %v1581_v18 = vadd.f32 1.0, %v232_v17 }
  0x82 LB: >> { %s1588_s3 = smov 0   ;;  %s1286_s30 = sphi %s1583_s30, %s247_s30  }
  0x83 LB: >>> { %s254_s18 = smul.u32 3, %s1286_s30  ;;  %v1299_v19 = vmov 0   ;;  %s256_s0 = scvt.s32.f32 %s1286_s30  ;;  %vm670_vm0 = vcmask 392192   ;;  %v1612_v39 = vsub.s32 0, %v1565_v3  ;;  %v1300_v45 = vmov 1966171168   ;;  %s1290_s3 = sphi %s1588_s3, %s253_s3  }
  0x84   : >>> { %714 = vmatprep.subr.bf16.mxu1 %v1299_v19  ;;  %s258_s23 = scvt.s32.f32 %s1290_s3  ;;  %v362_v46 = vunpack.c.l.s4 %v1300_v45 }
  0x85   : >>> { %s255_s22 = sadd.s32 %s1290_s3, %s254_s18  ;;  %s910_s25 = sadd.f32 -1.0, %s256_s0 }
  0x86   : >>> { %s262_s21 = scalar_lea.vmem %s1549_s8, %s255_s22 [#allocation2]  ;;  %s911_s29 = sadd.f32 -1.0, %s258_s23  ;;  %v363_v57 = vunpack.c.0.s8 %v362_v46 }
  0x87   : >>> { %s925_s24 = sshll.u32 %s255_s22, 4  ;;  %v260_v20 = vstv %s910_s25  ;;  %v263_v21 = vld [vmem:[%s262_s21] sm:$0x1]  ;;  %v912_v24 = vld [vmem:[%s262_s21 + $0x9] sm:$0x1]  ;;  %s253_s3 = sadd.s32 1, %s1290_s3  }
  0x88   : >>> { %s654_s4 = scalar_lea.vmem %s193_s9, %s925_s24 [#allocation5]  ;;  %v261_v22 = vadd.f32 %v260_v20, %v1579_v15  ;;  %v265_v23 = vstv %s911_s29  ;;  %v1640_v5 = vsub.s32 %v363_v57, %v1565_v3  ;;  %p250_p6 = scmp.ge.s32.totalorder %s253_s3, 3  }
  0x89   : >>> { %v1602_v25 = vld [vmem:[%s654_s4] sm:$0xff]  ;;  %v1604_v26 = vld [vmem:[%s654_s4 + $0x8] sm:$0xff]  ;;  %v266_v27 = vadd.f32 %v265_v23, %v1581_v18  ;;  %s247_s30 = sadd.s32 (%p250_p6), 1, %s1286_s30  }
  0x8a   : >>> { %v916_v28 = vcombine.high %v1602_v25, %v1602_v25  ;;  %v264_v29 = vadd.f32 %v263_v21, %v261_v22  ;;  %v918_v30 = vcombine.high %v1604_v26, %v1604_v26  ;;  %p244_p11 = scmp.ge.s32.totalorder (%p250_p6), %s247_s30, 3  }
  0x8b   : >>> { %v270_v31 = vadd.f32 %v912_v24, %v266_v27 }
  0x8c   : >>> { %706 = vmatprep.mubr.bf16.mxu0 %v916_v28  ;;  %v271_v32 = vfloor.f32 %v264_v29  ;;  %v283_v33 = vmax.f32 %v264_v29, 0.0  ;;  %919 = vmatprep.mubr.msk.bf16.mxu1 %vm670_vm0, %v918_v30 }
  0x8d   : >>> { %v272_v34 = vfloor.f32 %v270_v31  ;;  %v285_v35 = vmax.f32 %v270_v31, 0.0 }
  0x8e   : >>> { %v273_v36 = vadd.f32 1.0, %v271_v32  ;;  %v279_v37 = vmax.f32 %v271_v32, 0.0  ;;  %v284_v38 = vmin.f32 %v283_v33, 17.0 }
  0x8f   : >>> { %v276_v40 = vadd.f32 1.0, %v272_v34  ;;  %v281_v41 = vmax.f32 %v272_v34, 0.0  ;;  %v286_v42 = vmin.f32 %v285_v35, 17.0 }
  0x90   : >>> { %v274_v43 = vmax.f32 %v273_v36, 0.0  ;;  %v280_v44 = vmin.f32 %v279_v37, 17.0 }
  0x91   : >>> { %v277_v47 = vmax.f32 %v276_v40, 0.0  ;;  %v282_v48 = vmin.f32 %v281_v41, 17.0 }
  0x92   : >>> { %v275_v49 = vmin.f32 %v274_v43, 17.0  ;;  %v287_v50 = vsub.f32 %v280_v44, %v284_v38  ;;  %v1615_v51 = vrot.slane %v280_v44, %v1612_v39 }
  0x93   : >>> { %v278_v52 = vmin.f32 %v277_v47, 17.0  ;;  %v291_v53 = vsub.f32 %v282_v48, %v286_v42  ;;  %v329_v60 = vrot.slane %v282_v48, %v1612_v39 }
  0x94   : >>> { %v288_v54 = vadd.f32 1.0, %v287_v50  ;;  %v289_v55 = vsub.f32 %v275_v49, %v284_v38  ;;  %v1618_v56 = vrot.slane %v275_v49, %v1612_v39  ;;  %vm300_vm1 = vcmp.eq.f32.partialorder %v1575_v10, %v1615_v51 }
  0x95   : >>> { %v292_v58 = vadd.f32 1.0, %v291_v53  ;;  %v293_v59 = vsub.f32 %v278_v52, %v286_v42  ;;  %v343_v0 = vrot.slane %v278_v52, %v1612_v39  ;;  %vm299_vm3 = vcmp.eq.f32.partialorder %v1573_v8, %v1615_v51 }
  0x96   : >>> { %v290_v61 = vsub.f32 1.0, %v289_v55  ;;  %v1624_v62 = vrot.slane %v288_v54, %v1612_v39  ;;  %vm314_vm2 = vcmp.eq.f32.partialorder %v1575_v10, %v1618_v56  ;;  %vm313_vm4 = vcmp.eq.f32.partialorder %v1573_v8, %v1618_v56 }
  0x97   : >>> { %v294_v63 = vsub.f32 1.0, %v293_v59  ;;  %vm330_vm5 = vcmp.eq.f32.partialorder %v1573_v8, %v329_v60  ;;  %v336_v4 = vrot.slane %v292_v58, %v1612_v39  ;;  %vm332_vm6 = vcmp.eq.f32.partialorder %v1577_v11, %v329_v60 }
  0x98   : >>> { %v307_v1 = vsel %vm300_vm1, %v1624_v62, 0.0  ;;  %v1633_v2 = vrot.slane %v290_v61, %v1612_v39  ;;  %v306_v6 = vsel %vm299_vm3, %v1624_v62, 0.0  ;;  %vm344_vm7 = vcmp.eq.f32.partialorder %v1573_v8, %v343_v0 }
  0x99   : >>> { %v350_v9 = vrot.slane %v294_v63, %v1612_v39  ;;  %vm346_vm8 = vcmp.eq.f32.partialorder %v1577_v11, %v343_v0  ;;  %vm331_vm9 = vcmp.eq.f32.partialorder %v1575_v10, %v329_v60  ;;  %vm345_vm10 = vcmp.eq.f32.partialorder %v1575_v10, %v343_v0 }
  0x9a   : >>> { %v321_v7 = vsel %vm314_vm2, %v1633_v2, 0.0  ;;  %v320_v13 = vsel %vm313_vm4, %v1633_v2, 0.0  ;;  %v337_v16 = vsel %vm330_vm5, %v336_v4, 0.0  ;;  %v339_v17 = vsel %vm332_vm6, %v336_v4, 0.0 }
  0x9b   : >>> { %v324_v12 = vadd.f32 %v321_v7, %v307_v1  ;;  %v323_v14 = vadd.f32 %v320_v13, %v306_v6  ;;  %v351_v20 = vsel %vm344_vm7, %v350_v9, 0.0  ;;  %v353_v22 = vsel %vm346_vm8, %v350_v9, 0.0 }
  0x9c   : >>> { %v338_v28 = vsel %vm331_vm9, %v336_v4, 0.0  ;;  %v352_v29 = vsel %vm345_vm10, %v350_v9, 0.0  ;;  %v1657_v36 = vadd.f32 %v351_v20, %v337_v16  ;;  %v1659_v37 = vadd.f32 %v353_v22, %v339_v17 }
  0x9d   : >>> { %v416_v21 = vrot.slane %v324_v12, %v1640_v5  ;;  %v360_v23 = vcombine.high %v323_v14, %v323_v14  ;;  %v367_v24 = vrot.slane %v323_v14, %v1640_v5  ;;  %v409_v27 = vcombine.high %v324_v12, %v324_v12 }
  0x9e   : >>> { %v1664_v41 = vadd.f32 %v352_v29, %v338_v28  ;;  %vm301_vm11 = vcmp.eq.f32.partialorder %v1577_v11, %v1615_v51  ;;  %vm315_vm12 = vcmp.eq.f32.partialorder %v1577_v11, %v1618_v56 }
  0x9f   : >>> { %v424_v30 = vcombine.high %v416_v21, %v416_v21  ;;  %v432_v31 = vrot.slane %v416_v21, %v1640_v5  ;;  %v374_v32 = vrot.slane %v360_v23, %v1640_v5  ;;  %v375_v33 = vcombine.high %v367_v24, %v367_v24 }
  0xa0   : >>> { %v383_v34 = vrot.slane %v367_v24, %v1640_v5  ;;  %v423_v35 = vrot.slane %v409_v27, %v1640_v5 }
  0xa1   : >>> { %v1662_v38 = vrot.slane %v424_v30, %v1640_v5  ;;  %v454_v40 = vcombine.high %v432_v31, %v432_v31  ;;  %v376_v42 = vcombine.high %v374_v32, %v374_v32  ;;  %v1676_v47 = vrot.slane %v374_v32, %v1640_v5 }
  0xa2   : >>> { %v483_v43 = vrot.slane %v383_v34, %v1612_v39  ;;  %v1668_v44 = vrot.slane %v423_v35, %v1640_v5  ;;  %v1679_v48 = vrot.slane %v375_v33, %v1640_v5  ;;  %v405_v60 = vcombine.high %v383_v34, %v383_v34 }
  0xa3   : >>> { %v456_v45 = vcombine.high %v1662_v38, %v1662_v38  ;;  %v1673_v46 = vrot.slane %v454_v40, %v1612_v39  ;;  %v404_v49 = vrot.slane %v376_v42, %v1640_v5  ;;  %v406_v57 = vcombine.high %v1676_v47, %v1676_v47 }
  0xa4   : >>> { %v570_v50 = vmul.f32 %v483_v43, %v1657_v36  ;;  %v571_v52 = vmul.f32 %v483_v43, %v1664_v41  ;;  %v531_v53 = vrot.slane %v1668_v44, %v1612_v39  ;;  %v487_v58 = vrot.slane %v1679_v48, %v1612_v39 }
  0xa5   : >>> { %v527_v54 = vrot.slane %v456_v45, %v1612_v39  ;;  %v602_v55 = vmul.f32 %v1673_v46, %v1659_v37  ;;  %v1694_v59 = vrot.slane %v404_v49, %v1612_v39  ;;  %v408_v1 = vcombine.high %v404_v49, %v404_v49 }
  0xa6   : >>> { %v624_v7 = vpack.c.bf16 %v571_v52, %v570_v50  ;;  %v507_v9 = vrot.slane %v406_v57, %v1612_v39  ;;  %v606_v13 = vmul.f32 %v531_v53, %v1657_v36  ;;  %v572_v14 = vmul.f32 %v483_v43, %v1659_v37 }
  0xa7   : >>> { %v603_v61 = vmul.f32 %v527_v54, %v1657_v36  ;;  %v604_v63 = vmul.f32 %v527_v54, %v1664_v41  ;;  %v605_v0 = vmul.f32 %v527_v54, %v1659_v37  ;;  %v586_v4 = vmul.f32 %v1694_v59, %v1664_v41 }
  0xa8   : >>> { %v587_v6 = vmul.f32 %v1694_v59, %v1659_v37  ;;  %v573_v16 = vmul.f32 %v487_v58, %v1657_v36  ;;  %v588_v20 = vmul.f32 %v507_v9, %v1657_v36  ;;  %v589_v21 = vmul.f32 %v507_v9, %v1664_v41 }
  0xa9   : >>> { %v640_v12 = vpack.c.bf16 %v603_v61, %v602_v55  ;;  %v425_v22 = vcombine.high %v423_v35, %v423_v35  ;;  %v641_v23 = vpack.c.bf16 %v605_v0, %v604_v63  ;;  %v607_v24 = vmul.f32 %v531_v53, %v1664_v41 }
  0xaa   : >>> { %v632_v17 = vpack.c.bf16 %v587_v6, %v586_v4  ;;  %v511_v27 = vrot.slane %v408_v1, %v1612_v39  ;;  %v590_v28 = vmul.f32 %v507_v9, %v1659_v37  ;;  %v633_v29 = vpack.c.bf16 %v589_v21, %v588_v20 }
  0xab   : >>> { %715 = vmatpush1.bf16.msra.mxu1 %v640_v12  ;;  %v453_v30 = vrot.slane %v425_v22, %v1640_v5  ;;  %v515_v32 = vrot.slane %v432_v31, %v1612_v39  ;;  %v625_v33 = vpack.c.bf16 %v573_v16, %v572_v14  ;;  %v574_v35 = vmul.f32 %v487_v58, %v1664_v41 }
  0xac   : >>> { %716 = vmatprep.subr.bf16.mxu1 %v1299_v19  ;;  %926 = vmatprep.subr.bf16.mxu0 %v632_v17  ;;  %v591_v34 = vmul.f32 %v511_v27, %v1657_v36  ;;  %v575_v40 = vmul.f32 %v487_v58, %v1659_v37  ;;  %v592_v43 = vmul.f32 %v511_v27, %v1664_v41  ;;  %v308_v58 = vsel %vm301_vm11, %v1624_v62, 0.0 }
  0xad   : >>> { %927 = vmatpush3.bf16.msra.mxu0 %v624_v7  ;;  %v535_v42 = vrot.slane %v453_v30, %v1612_v39  ;;  %v593_v45 = vmul.f32 %v511_v27, %v1659_v37  ;;  %v491_v49 = vrot.slane %v405_v60, %v1612_v39  ;;  %v642_v50 = vpack.c.bf16 %v607_v24, %v606_v13 }
  0xae   : >>> { %928 = vmatprep.subr.bf16.mxu0 %v633_v29  ;;  %v608_v31 = vmul.f32 %v531_v53, %v1659_v37  ;;  %v634_v52 = vpack.c.bf16 %v591_v34, %v590_v28  ;;  %v455_v54 = vcombine.high %v1668_v44, %v1668_v44  ;;  %v594_v57 = vmul.f32 %v515_v32, %v1657_v36 }
  0xaf   : >>> { %717 = vmatpush1.bf16.msra.mxu1 %v641_v23  ;;  %v609_v55 = vmul.f32 %v535_v42, %v1657_v36  ;;  %v322_v53 = vsel %vm315_vm12, %v1633_v2, 0.0  ;;  %v626_v60 = vpack.c.bf16 %v575_v40, %v574_v35  ;;  %v576_v44 = vmul.f32 %v491_v49, %v1657_v36 }
  0xb0   : >>> { %718 = vmatprep.subr.bf16.mxu1 %v1299_v19  ;;  %v577_v61 = vmul.f32 %v491_v49, %v1664_v41  ;;  %v407_v63 = vcombine.high %v1679_v48, %v1679_v48  ;;  %v610_v0 = vmul.f32 %v535_v42, %v1664_v41  ;;  %v611_v51 = vmul.f32 %v535_v42, %v1659_v37 }
  0xb1   : >>> { %929 = vmatpush3.bf16.msra.mxu0 %v625_v33  ;;  %v635_v62 = vpack.c.bf16 %v593_v45, %v592_v43  ;;  %v595_v1 = vmul.f32 %v515_v32, %v1664_v41  ;;  %v643_v56 = vpack.c.bf16 %v609_v55, %v608_v31  ;;  %v539_v2 = vrot.slane %v455_v54, %v1612_v39 }
  0xb2   : >>> { %930 = vmatprep.subr.bf16.mxu0 %v634_v52  ;;  %v495_v4 = vrot.slane %v407_v63, %v1612_v39  ;;  %v457_v6 = vcombine.high %v453_v30, %v453_v30  ;;  %v519_v48 = vrot.slane %v1662_v38, %v1612_v39  ;;  %v627_v7 = vpack.c.bf16 %v577_v61, %v576_v44 }
  0xb3   : >>> { %719 = vmatpush1.bf16.msra.mxu1 %v642_v50  ;;  %v578_v9 = vmul.f32 %v491_v49, %v1659_v37  ;;  %v325_v13 = vadd.f32 %v322_v53, %v308_v58  ;;  %v636_v14 = vpack.c.bf16 %v595_v1, %v594_v57  ;;  %v596_v16 = vmul.f32 %v515_v32, %v1659_v37 }
  0xb4   : >>> { %720 = vmatprep.subr.bf16.mxu1 %v1299_v19  ;;  %v579_v12 = vmul.f32 %v495_v4, %v1657_v36  ;;  %v597_v17 = vmul.f32 %v519_v48, %v1657_v36  ;;  %v644_v20 = vpack.c.bf16 %v611_v51, %v610_v0  ;;  %v612_v21 = vmul.f32 %v539_v2, %v1657_v36 }
  0xb5   : >>> { %931 = vmatpush3.bf16.msra.mxu0 %v626_v60  ;;  %v613_v22 = vmul.f32 %v539_v2, %v1664_v41  ;;  %v543_v38 = vrot.slane %v457_v6, %v1612_v39  ;;  %v580_v23 = vmul.f32 %v495_v4, %v1664_v41  ;;  %v581_v27 = vmul.f32 %v495_v4, %v1659_v37 }
  0xb6   : >>> { %932 = vmatprep.subr.bf16.mxu0 %v635_v62  ;;  %v628_v24 = vpack.c.bf16 %v579_v12, %v578_v9  ;;  %v499_v28 = vrot.slane %v1676_v47, %v1612_v39  ;;  %v464_v29 = vrot.slane %v325_v13, %v1640_v5  ;;  %v614_v30 = vmul.f32 %v539_v2, %v1659_v37  ;;  %v651_v13 = vld [vmem:[%s1567_s7] sm:$0xff] }
  0xb7   : >>> { %721 = vmatpush1.bf16.msra.mxu1 %v643_v56  ;;  %v637_v32 = vpack.c.bf16 %v597_v17, %v596_v16  ;;  %v598_v33 = vmul.f32 %v519_v48, %v1664_v41  ;;  %v599_v34 = vmul.f32 %v519_v48, %v1659_v37  ;;  %v645_v35 = vpack.c.bf16 %v613_v22, %v612_v21 }
  0xb8   : >>> { %722 = vmatprep.subr.bf16.mxu1 %v1299_v19  ;;  %v615_v40 = vmul.f32 %v543_v38, %v1657_v36  ;;  %v472_v42 = vrot.slane %v464_v29, %v1640_v5  ;;  %v465_v43 = vcombine.high %v464_v29, %v464_v29  ;;  %v629_v47 = vpack.c.bf16 %v581_v27, %v580_v23 }
  0xb9   : >>> { %933 = vmatpush3.bf16.msra.mxu0 %v627_v7  ;;  %v582_v45 = vmul.f32 %v499_v28, %v1657_v36  ;;  %v583_v49 = vmul.f32 %v499_v28, %v1664_v41  ;;  %v616_v50 = vmul.f32 %v543_v38, %v1664_v41  ;;  %v638_v31 = vpack.c.bf16 %v599_v34, %v598_v33 }
  0xba   : >>> { %934 = vmatprep.subr.bf16.mxu0 %v636_v14  ;;  %v600_v52 = vmul.f32 %v1673_v46, %v1657_v36  ;;  %v601_v54 = vmul.f32 %v1673_v46, %v1664_v41  ;;  %v646_v55 = vpack.c.bf16 %v615_v40, %v614_v30  ;;  %v617_v57 = vmul.f32 %v543_v38, %v1659_v37 }
  0xbb   : >>> { %723 = vmatpush1.bf16.msra.mxu1 %v644_v20  ;;  %v547_v58 = vrot.slane %v472_v42, %v1612_v39  ;;  %v479_v53 = vrot.slane %v465_v43, %v1640_v5  ;;  %v630_v60 = vpack.c.bf16 %v583_v49, %v582_v45  ;;  %v584_v44 = vmul.f32 %v499_v28, %v1659_v37 }
  0xbc   : >>> { %724 = vmatprep.subr.bf16.mxu1 %v1299_v19  ;;  %v585_v61 = vmul.f32 %v1694_v59, %v1657_v36  ;;  %v639_v63 = vpack.c.bf16 %v601_v54, %v600_v52  ;;  %v647_v46 = vpack.c.bf16 %v617_v57, %v616_v50  ;;  %v915_v2 = vcombine.low %v1602_v25, %v1602_v25 }
  0xbd   : >>> { %935 = vmatpush3.bf16.msra.mxu0 %v628_v24  ;;  %v618_v0 = vmul.f32 %v547_v58, %v1657_v36  ;;  %v619_v51 = vmul.f32 %v547_v58, %v1664_v41  ;;  %v551_v62 = vrot.slane %v479_v53, %v1612_v39  ;;  %v620_v56 = vmul.f32 %v547_v58, %v1659_v37 }
  0xbe   : >>> { %936 = vmatprep.subr.bf16.mxu0 %v637_v32  ;;  %v631_v5 = vpack.c.bf16 %v585_v61, %v584_v44 }
  0xbf   : >>> { %725 = vmatpush1.bf16.msra.mxu1 %v645_v35  ;;  %v648_v1 = vpack.c.bf16 %v619_v51, %v618_v0  ;;  %v621_v59 = vmul.f32 %v551_v62, %v1657_v36  ;;  %v622_v39 = vmul.f32 %v551_v62, %v1664_v41  ;;  %v623_v6 = vmul.f32 %v551_v62, %v1659_v37 }
  0xc0   : >>> { %726 = vmatprep.subr.bf16.mxu1 %v1299_v19  ;;  %v917_v36 = vcombine.low %v1604_v26, %v1604_v26 }
  0xc1   : >>> { %937 = vmatpush3.bf16.msra.mxu0 %v629_v47  ;;  %v649_v4 = vpack.c.bf16 %v621_v59, %v620_v56  ;;  %v650_v48 = vpack.c.bf16 %v623_v6, %v622_v39 }
  0xc2   : >>> { %938 = vmatprep.subr.bf16.mxu0 %v638_v31 }
  0xc3   : >>> { %727 = vmatpush1.bf16.msra.mxu1 %v646_v55 }
  0xc4   : >>> { %728 = vmatprep.subr.bf16.mxu1 %v1299_v19 }
  0xc5   : >>> { %939 = vmatpush3.bf16.msra.mxu0 %v630_v60 }
  0xc6   : >>> { %940 = vmatprep.subr.bf16.mxu0 %v639_v63 }
  0xc7   : >>> { %729 = vmatpush1.bf16.msra.mxu1 %v647_v46 }
  0xc8   : >>> { %730 = vmatprep.subr.bf16.mxu1 %v1299_v19 }
  0xc9   : >>> { %941 = vmatpush3.bf16.msra.mxu0 %v631_v5 }
  0xcb   : >>> { %731 = vmatpush1.bf16.msra.mxu1 %v648_v1 }
  0xcc   : >>> { %732 = vmatprep.subr.bf16.mxu1 %v1299_v19  ;;  %707 = vmatmul.mubr.bf16.vlgmr.msra.gmra.mrb[0].mxu0 %v915_v2 }
  0xcf   : >>> { %733 = vmatpush1.bf16.msra.mxu1 %v649_v4 }
  0xd0   : >>> { %734 = vmatprep.subr.bf16.mxu1 %v1299_v19 }
  0xd3   : >>> { %735 = vmatpush1.bf16.msra.mxu1 %v650_v48 }
  0xd6   : >>> { %747 = vmatmul.mubr.bf16.vlgmr.msra.gmra.mrb[0].mxu1 %v917_v36 }
 0x19f   : >>> { %v942_v25 = vpop.f32.mrb[0].mxu0 }
 0x1a0   : >>> { %v943_v7 = vpop.f32.mrb[1].mxu0 }
 0x1a1   : >>> { %v944_v9 = vadd.f32 %v943_v7, %v942_v25  ;;  %v945_v12 = vpop.f32.mrb[2].mxu0 }
 0x1a2   : >>> { %v946_v41 = vpop.f32.mrb[3].mxu0 }
 0x1a8   : >> { %252 = sbr.rel (!%p250_p6) target bundleno = 131 (0x83), region = 103 }
 0x1a9   : >>> { %v748_v37 = vpop.f32.mrb[0].mxu1 }
 0x1aa   : >>> { %v749_v14 = vadd.f32 %v944_v9, %v748_v37  ;;  %v750_v16 = vpop.f32.mrb[1].mxu1 }
 0x1ab   : >>> { %v751_v17 = vpop.f32.mrb[2].mxu1 }
 0x1ac   : >>> { %v754_v20 = vadd.f32 %v749_v14, %v651_v13  ;;  %v752_v21 = vpop.f32.mrb[3].mxu1 }
 0x1ae   : >>> { %755 = vst [vmem:[%s1567_s7] sm:$0xff] %v754_v20 }
 0x1af   : > { %246 = sbr.rel (!%p244_p11) target bundleno = 130 (0x82), region = 114  ;;  %s921_s18 = sshll.u32 (%p244_p11), %s1270_s16, 1 }
 0x1b0   : > { %s768_s0 = sadd.s32 (%p244_p11), %s1266_s15, %s921_s18  ;;  %s772_s22 = sshll.u32 (%p244_p11), %s1567_s7, 4  ;;  %s1811_s22 = int_to_ptr.vmem [resolvable:$true] %s772_s22 }
 0x1b1   : > { %s922_s23 = sshll.u32 (%p244_p11), %s768_s0, 7  ;;  %s757_s30 = scalar_lea.sflag (%p244_p11), [#allocation4], %s1545_s26 }
 0x1b2   : > { %s770_s21 = scalar_lea.hbm (%p244_p11), %s1872_s2, %s922_s23  ;;  %s1148_s29 = scalar_lea.vmem (%p244_p11), %s1811_s22, 128 }
 0x1b3   : > { %p1149_p5 = scmp.ne.s32.totalorder (%p244_p11), %s1811_s22, %s1148_s29  ;;  %p1906_p12 = scmp.ne.s32.totalorder (%p244_p11), %s1889_s27, 0 }
 0x1b4   : > { %s1301_s8 = smov (%p244_p11), [#allocation7]  }
 0x1b5   : > { %p1150_p3 = pnand (%p244_p11), %p1149_p5, %p1906_p12  ;;  %s1152_s16 = sshll.u32 (%p244_p11), %s1301_s8, 4  ;;  %s1153_s16 = int_to_ptr.vmem [resolvable:$false] %s1152_s16 }
 0x1b6   : > { %s1154_s15 = scalar_lea.vmem %s1153_s16, 256  ;;  %p1155_p2 = scmp.lt.s32.totalorder %s1811_s22, %s1153_s16 }
 0x1b7   : > { %p1151_p7 = pneg %p1150_p3  ;;  %p1156_p9 = scmp.lt.s32.totalorder %s1154_s15, %s1148_s29 }
 0x1b9   : > { %p1157_p0 = por %p1156_p9, %p1155_p2 }
 0x1bb   : > { %p1158_p1 = pnand %p1157_p0, %p1151_p7 }
 0x1bd   : > { %1161 = shalt.err (!%p1158_p1)
}
 0x1be   : > { %s1162_s6 = scalar_lea.hbm %s770_s21, 128  ;;  %s1166_s7 = scalar_lea.hbm %s1872_s2, 512 }
 0x1bf   : > { %p1163_p4 = scmp.ne.s32.totalorder %s770_s21, %s1162_s6  ;;  %p1167_p10 = scmp.lt.u32.totalorder %s770_s21, %s1872_s2 }
 0x1c0   : > { %p1168_p6 = scmp.lt.u32.totalorder %s1166_s7, %s1162_s6  ;;  %p1170_p5 = scmp.lt.u32.totalorder %s1162_s6, %s770_s21 }
 0x1c1   : > { %p1164_p13 = pnand %p1163_p4, %p1906_p12 }
 0x1c2   : > { %p1169_p11 = por %p1168_p6, %p1167_p10 }
 0x1c3   : > { %p1165_p8 = pneg %p1164_p13 }
 0x1c4   : > { %p1171_p3 = por %p1170_p5, %p1169_p11 }
 0x1c6   : > { %p1172_p7 = pnand %p1171_p3, %p1165_p8 }
 0x1c8   : > { %1175 = shalt.err (!%p1172_p7)
}
 0x1c9   : > { %958 = dma.vmem_to_hbm [thread:$0]  (%p1906_p12), %s1811_s22, 128, %s770_s21, %s757_s30  }
 0x1ca PF: > { %p972_p2 = scmp.ge.s32.totalorder %s1282_s19, 2  ;;  %s784_s18 = sand.u32 1, %s1254_s12  }
 0x1cb   : > { %p1907_p9 = scmp.ne.s32.totalorder %s1890_s28, 0  ;;  %s785_s0 = scalar_lea.sflag [#allocation4], %s784_s18 }
 0x1cd   : > { %p968_p0 = pnand %p972_p2, %p1907_p9 }
 0x1cf   : > { %1237 = dma.done.wait (!%p968_p0), %s785_s0, 128  }
 0x1d0   : > { %1239 = vsyncadd (!%p968_p0), %s785_s0, 4294967168  ;;  %s21_s19 = sadd.s32 1, %s1282_s19   ;;  %s1908_s16 = sld [smem:[#allocation11_spill]] }
 0x1d1   : > { %p18_p1 = scmp.ge.s32.totalorder %s21_s19, 6   ;;  %s1909_s27 = sld [smem:[#allocation12_spill]] }
 0x1d2   : > { %s1910_s18 = sld [smem:[#allocation13_spill]]  ;;  %s1911_s9 = smov %s1246_s10 }
 0x1d3   : > { %s1912_s10 = smov %s1250_s11  ;;  %s1913_s11 = smov %s1479_s20 }
 0x1d4   : > { %s1914_s12 = smov %s1258_s13  ;;  %s1915_s13 = smov %s1262_s14 }
 0x1d5   : > { %s1916_s14 = smov %s1418_s5  ;;  %s1917_s15 = smov %s1274_s17 }
 0x1d6   :  { %20 = sbr.rel (!%p18_p1) target bundleno = 13 (0xd), region = 125 }
 0x1d7   : > { %s1918_s17 = smov %s1909_s27 }
 0x1dd   :  { %790 = vsyncpa [#allocation3], 1 }
 0x1de   :  { %792 = vsyncpa [#allocation3 + $0x1], 1 }
 0x1df   :  { %793 = vsyncpa [#allocation6], 1 }
 0x1e0   :  { %795 = vsyncpa [#allocation6 + $0x1], 1 }
 0x1e1   :  { %796 = vsyncpa [#allocation4], 1 }
 0x1e2   :  { %798 = vsyncpa [#allocation4 + $0x1], 1 }

</bundles_post_ra>
